<compile_context>
chip_gen: v6e
topology: v6e:2x2x1
jax: 0.10.0
libtpu: 0.0.40
codegen_flags: <defaults>
</compile_context>

<pallas_src>
import functools

import jax
import jax.numpy as jnp
from jax import lax
from jax.experimental import pallas as pl
from jax.experimental.pallas import tpu as pltpu


def _round_up(n, m):
    return ((n + m - 1) // m) * m


def _radiusnet_kernel(x_ref, w1_ref, w2_ref, b2_ref, out_ref, *, chunk, n_chunks):
    # x_ref:  (8, TB)   bf16   [x^T ; ones]  (features on sublanes, batch on lanes)
    # w1_ref: (256, 8)  bf16   0.5 * [W1 | b1]   (out, in+1)
    # w2_ref: (256, 1)  f32    0.5 * W2^T column
    # b2_ref: (1, 1)    f32    b2 + 0.5*sum(W2)  (SMEM scalar)
    # out_ref:(1, TB)   f32    lane-dense output tile
    w1 = w1_ref[...]
    b2 = b2_ref[0, 0]
    # Hoist the lane-broadcast of w2 out of the chunk loop (JAX doesn't CSE it).
    w2_b = jnp.broadcast_to(w2_ref[...], (256, chunk))

    def body(j, carry):
        start = pl.multiple_of(j * chunk, chunk)
        xc = x_ref[:, pl.ds(start, chunk)]                           # (8, chunk) bf16
        # fc1 (with b1 folded in and pre-halved): z2 = 0.5*(W1 x + b1), f32 accum.
        z2 = jnp.dot(w1, xc, preferred_element_type=jnp.float32)     # (256, chunk)
        # sigmoid via tanh (single EUP push per vreg); 0.5/0.5 folded into weights.
        t = jnp.tanh(z2)
        # fc2: VPU multiply + sublane reduction; result already lane-dense.
        y = jnp.sum(t * w2_b, axis=0, keepdims=True) + b2            # (1, chunk)
        out_ref[:, pl.ds(start, chunk)] = y.astype(out_ref.dtype)
        return carry

    lax.fori_loop(0, n_chunks, body, 0, unroll=True)


def radiusnet_forward(x, w1, b1, w2, b2, *, tb_max=2048, chunk=512):
    """x: (B, 7) f32.  w1: (256, 7), b1: (256,), w2: (1, 256), b2: (1,) (PyTorch layout).

    Returns (B, 1) f32 = Linear(256,1)(sigmoid(Linear(7,256)(x))).
    """
    assert x.ndim == 2 and x.shape[1] == 7
    assert chunk % 128 == 0 and tb_max % chunk == 0
    B = x.shape[0]

    # Batch tile: multiple of 128 (lane-dense), at most tb_max, and sized so the
    # grid has >= 2 steps whenever possible (v7x megacore engages only then).
    half = -(-B // 2)
    TB = min(tb_max, _round_up(max(half, 1), 128))
    CHUNK = min(chunk, TB)
    TB = _round_up(TB, CHUNK)
    n_chunks = TB // CHUNK
    n_tiles = pl.cdiv(B, TB)
    B_pad = n_tiles * TB

    # x_aug = [x^T ; ones] in bf16, zero-padded along lanes to B_pad.  Padded
    # columns (including the ones-row) are zero -> tanh(0) junk, discarded below.
    x_t = jnp.concatenate(
        [x.astype(jnp.float32).T, jnp.ones((1, B), jnp.float32)], axis=0)
    x_t = x_t.astype(jnp.bfloat16)
    if B_pad != B:
        x_t = jnp.pad(x_t, ((0, 0), (0, B_pad - B)))

    # Weight prep (tiny, one-time): fold b1, fold the sigmoid 0.5-factors.
    # Note bf16(0.5*w) == 0.5*bf16(w) exactly, so precision matches the unfused form.
    w1_aug = (0.5 * jnp.concatenate(
        [w1.astype(jnp.float32), b1.reshape(256, 1).astype(jnp.float32)], axis=1)
    ).astype(jnp.bfloat16)                                            # (256, 8)
    w2_col = (0.5 * w2.astype(jnp.float32)).reshape(256, 1)           # (256, 1)
    b2_eff = (b2.astype(jnp.float32).reshape(()) +
              0.5 * jnp.sum(w2.astype(jnp.float32))).reshape(1, 1)    # (1, 1)

    kernel = functools.partial(_radiusnet_kernel, chunk=CHUNK, n_chunks=n_chunks)

    out = pl.pallas_call(
        kernel,
        out_shape=jax.ShapeDtypeStruct((1, B_pad), jnp.float32),
        grid=(n_tiles,),
        in_specs=[
            pl.BlockSpec((8, TB), lambda i: (0, i)),             # x_aug: streamed
            pl.BlockSpec((256, 8), lambda i: (0, 0)),            # W1_aug: resident
            pl.BlockSpec((256, 1), lambda i: (0, 0)),            # w2 col: resident
            pl.BlockSpec(memory_space=pltpu.MemorySpace.SMEM),   # b2 scalar
        ],
        out_specs=pl.BlockSpec((1, TB), lambda i: (0, i)),       # lane-dense
        compiler_params=pltpu.CompilerParams(
            dimension_semantics=("parallel",)),
    )(x_t, w1_aug, w2_col, b2_eff)

    # Lane-dense (1, B_pad) slab -> (B, 1), dropping padded tail columns.
    return out.reshape(-1)[:B].reshape(B, 1)


def init_params(key):
    # PyTorch nn.Linear layout: weight (out, in), bias (out,); U(+-1/sqrt(fan_in)).
    k1, k2, k3, k4 = jax.random.split(key, 4)
    bound1 = 1.0 / jnp.sqrt(7.0)
    bound2 = 1.0 / jnp.sqrt(256.0)
    w1 = jax.random.uniform(k1, (256, 7), jnp.float32, -bound1, bound1)
    b1 = jax.random.uniform(k2, (256,), jnp.float32, -bound1, bound1)
    w2 = jax.random.uniform(k3, (1, 256), jnp.float32, -bound2, bound2)
    b2 = jax.random.uniform(k4, (1,), jnp.float32, -bound2, bound2)
    return w1, b1, w2, b2


def reference_forward(x, w1, b1, w2, b2):
    # Matches the kernel's bf16 rounding of x and of the folded [W1|b1] block;
    # fc2 is done as an elementwise multiply + f32 sum (same as the kernel) so the
    # reference doesn't reintroduce matmul-precision differences.
    xb = x.astype(jnp.bfloat16).astype(jnp.float32)
    w1b = w1.astype(jnp.bfloat16).astype(jnp.float32)
    b1b = b1.astype(jnp.bfloat16).astype(jnp.float32)
    h = jax.nn.sigmoid(xb @ w1b.T + b1b[None, :])
    return (h * w2.reshape(1, 256)).sum(-1, keepdims=True) + b2.reshape(1, 1)


if __name__ == "__main__":
    key = jax.random.PRNGKey(0)
    kx, kp = jax.random.split(key)
    w1, b1, w2, b2 = init_params(kp)

    # Small batch: single tile, single chunk.
    B = 8
    x = jax.random.normal(kx, (B, 7), jnp.float32)
    out = jax.block_until_ready(radiusnet_forward(x, w1, b1, w2, b2))
    ref = reference_forward(x, w1, b1, w2, b2)
    assert out.shape == (B, 1)
    assert jnp.allclose(out, ref, atol=1e-3, rtol=1e-3)

    # Two grid steps + padded tail (TB=256, 212 padded lanes in the last tile).
    B2 = 300
    x2 = jax.random.normal(jax.random.fold_in(kx, 1), (B2, 7), jnp.float32)
    out2 = jax.block_until_ready(radiusnet_forward(x2, w1, b1, w2, b2))
    ref2 = reference_forward(x2, w1, b1, w2, b2)
    assert out2.shape == (B2, 1)
    assert jnp.allclose(out2, ref2, atol=1e-3, rtol=1e-3)

    # Multi-chunk inner loop + multi-tile grid + padded tail
    # (TB=1024, CHUNK=512 -> 2 unrolled chunks per step, 2 grid steps).
    B3 = 1200
    x3 = jax.random.normal(jax.random.fold_in(kx, 2), (B3, 7), jnp.float32)
    out3 = jax.block_until_ready(radiusnet_forward(x3, w1, b1, w2, b2))
    ref3 = reference_forward(x3, w1, b1, w2, b2)
    assert out3.shape == (B3, 1)
    assert jnp.allclose(out3, ref3, atol=1e-3, rtol=1e-3)

    print("KERNEL_OK")
</pallas_src>

<mosaic_0001>
module attributes {stable_mosaic.version = 11 : i64} {
  func.func @_radiusnet_kernel(%arg0: i32, %arg1: memref<8x128xbf16, #tpu.memory_space<vmem>>, %arg2: memref<256x8xbf16, #tpu.memory_space<vmem>>, %arg3: memref<256x1xf32, #tpu.memory_space<vmem>>, %arg4: memref<1x1xf32, #tpu.memory_space<smem>>, %arg5: memref<1x128xf32, #tpu.memory_space<vmem>>) attributes {dimension_semantics = [#tpu.dimension_semantics<parallel>], iteration_bounds = array<i64: 1>, scalar_prefetch = 0 : i64, scratch_operands = 0 : i64, tpu.core_type = #tpu.core_type<tc>, window_params = [{transform_indices = @transform_0, window_bounds = array<i64: 8, 128>}, {pipeline_mode = #tpu.pipeline_mode<synchronous>, transform_indices = @transform_1, window_bounds = array<i64: 256, 8>}, {pipeline_mode = #tpu.pipeline_mode<synchronous>, transform_indices = @transform_2, window_bounds = array<i64: 256, 1>}, {transform_indices = @transform_3, window_bounds = array<i64: 1, 1>}, {transform_indices = @transform_4, window_bounds = array<i64: 1, 128>}]} {
    %c0 = arith.constant 0 : index
    %c0_0 = arith.constant 0 : index
    %0 = vector.load %arg2[%c0, %c0_0] : memref<256x8xbf16, #tpu.memory_space<vmem>>, vector<256x8xbf16>
    %c0_1 = arith.constant 0 : index
    %c0_2 = arith.constant 0 : index
    %1 = memref.load %arg4[%c0_1, %c0_2] : memref<1x1xf32, #tpu.memory_space<smem>>
    %c0_3 = arith.constant 0 : index
    %c0_4 = arith.constant 0 : index
    %2 = vector.load %arg3[%c0_3, %c0_4] : memref<256x1xf32, #tpu.memory_space<vmem>>, vector<256x1xf32>
    %3 = vector.shape_cast %2 : vector<256x1xf32> to vector<256x1xf32>
    %4 = vector.broadcast %3 : vector<256x1xf32> to vector<256x128xf32>
    %c0_i32 = arith.constant 0 : i32
    %c128_i32 = arith.constant 128 : i32
    %5 = arith.muli %c0_i32, %c128_i32 : i32
    %6 = tpu.assume_multiple %5, 128 : i32
    %c0_5 = arith.constant 0 : index
    %7 = arith.index_cast %6 : i32 to index
    %8 = vector.load %arg1[%c0_5, %7] : memref<8x128xbf16, #tpu.memory_space<vmem>>, vector<8x128xbf16>
    %cst = arith.constant dense<0.000000e+00> : vector<256x128xf32>
    %9 = tpu.matmul %0, %8, %cst {dimension_numbers = #tpu.dot_dimension_numbers<[1], [0], [0], [1], [0, 0, 1, 1], [], []>} : vector<256x8xbf16>, vector<8x128xbf16>, vector<256x128xf32> -> vector<256x128xf32>
    %10 = math.tanh %9 : vector<256x128xf32>
    %11 = arith.mulf %10, %4 : vector<256x128xf32>
    %cst_6 = arith.constant dense<0.000000e+00> : vector<128xf32>
    %12 = vector.multi_reduction <add>, %11, %cst_6 [0] : vector<256x128xf32> to vector<128xf32>
    %13 = vector.shape_cast %12 : vector<128xf32> to vector<1x128xf32>
    %14 = vector.broadcast %1 : f32 to vector<1x128xf32>
    %15 = arith.addf %13, %14 : vector<1x128xf32>
    %c0_7 = arith.constant 0 : index
    %16 = arith.index_cast %6 : i32 to index
    %17 = vector.load %arg5[%c0_7, %16] : memref<1x128xf32, #tpu.memory_space<vmem>>, vector<1x128xf32>
    tpu.vector_store %arg5[%c0_7, %16], %15 {strides = array<i32>} : memref<1x128xf32, #tpu.memory_space<vmem>>, vector<1x128xf32>,
    %c1_i32 = arith.constant 1 : i32
    return
  }
  func.func @transform_0(%arg0: i32) -> (i32, i32) {
    %c0_i32 = arith.constant 0 : i32
    %c0_i32_0 = arith.constant 0 : i32
    return %c0_i32, %arg0 : i32, i32
  }
  func.func @transform_1(%arg0: i32) -> (i32, i32) {
    %c0_i32 = arith.constant 0 : i32
    %c0_i32_0 = arith.constant 0 : i32
    %c0_i32_1 = arith.constant 0 : i32
    return %c0_i32, %c0_i32_0 : i32, i32
  }
  func.func @transform_2(%arg0: i32) -> (i32, i32) {
    %c0_i32 = arith.constant 0 : i32
    %c0_i32_0 = arith.constant 0 : i32
    %c0_i32_1 = arith.constant 0 : i32
    return %c0_i32, %c0_i32_0 : i32, i32
  }
  func.func @transform_3(%arg0: i32) -> (i32, i32) {
    %c0_i32 = arith.constant 0 : i32
    %c0_i32_0 = arith.constant 0 : i32
    %c0_i32_1 = arith.constant 0 : i32
    return %c0_i32, %c0_i32_0 : i32, i32
  }
  func.func @transform_4(%arg0: i32) -> (i32, i32) {
    %c0_i32 = arith.constant 0 : i32
    %c0_i32_0 = arith.constant 0 : i32
    return %c0_i32, %arg0 : i32, i32
  }
}

</mosaic_0001>

<bundles_post_ra>
// kernel: tpu_custom_call.1
= control target key start
LH: loop header
LB: loop body
LE: loop exit
PB: predicated region body
PF: predicated region fallthrough
CT: control target
= control target key end

     0   :  { %vm375_vm0 = vcmask 1043456   ;;  %vm326_vm1 = vcmask 64512   ;;  %v851_v5 = vmov 0   ;;  %s1077_s0 = inlined_call_operand.vmem [shape: bf16[8,128], index: 0, kind: input, shape index: {}]   ;;  %s1078_s1 = inlined_call_operand.vmem [shape: bf16[256,8], index: 1, kind: input, shape index: {}]   ;;  %s1079_s2 = inlined_call_operand.vmem [shape: f32[256,1], index: 2, kind: input, shape index: {}]   ;;  %s1080_s3 = inlined_call_operand.<no memory space> [shape: f32[1,1], index: 3, kind: input, shape index: {}]   ;;  %s1081_s4 = inlined_call_operand.hbm [shape: f32[1,128], index: 4, kind: output, shape index: {}]  }
   0x1   :  { %v245_v0 = vld [vmem:[%s1077_s0] sm:$0xf]  ;;  %v751_v4 = vld [vmem:[%s1078_s1 + $0x8] sm:$0xff]   ;;  %747 = vset.pattern.permute.xlu0 %v851_v5  ;;  %748 = vset.pattern.permute.xlu1 %v851_v5  ;;  %v753_v7 = vld [vmem:[%s1078_s1 + $0x10] sm:$0xff]  }
   0x2   :  { %v749_v1 = vld [vmem:[%s1078_s1] sm:$0xff]   ;;  %743 = vmatprep.subr.msk.bf16.mxu0 %vm375_vm0, %v245_v0  ;;  %744 = vmatprep.subr.msk.bf16.mxu1 %vm375_vm0, %v245_v0  ;;  %v377_v2 = vsel %vm375_vm0, %v245_v0, 0  ;;  %v752_v6 = vld [vmem:[%s1078_s1 + $0x48] sm:$0xff]   ;;  %v754_v8 = vld [vmem:[%s1078_s1 + $0x50] sm:$0xff]  }
   0x3   :  { %708 = vmatpush3.bf16.msra.mxu0 %v377_v2  ;;  %742 = vmatpush3.bf16.msra.mxu1 %v377_v2  ;;  %v750_v3 = vld [vmem:[%s1078_s1 + $0x40] sm:$0xff]   ;;  %v755_v9 = vld [vmem:[%s1078_s1 + $0x18] sm:$0xff]   ;;  %v759_v14 = vld [vmem:[%s1078_s1 + $0x28] sm:$0xff]  }
   0x4   :  { %709 = vmatprep.mubr.msk.bf16.mxu0 %vm326_vm1, %v749_v1  ;;  %725 = vmatprep.mubr.msk.bf16.mxu1 %vm326_vm1, %v750_v3  ;;  %v756_v10 = vld [vmem:[%s1078_s1 + $0x58] sm:$0xff]   ;;  %v757_v11 = vld [vmem:[%s1078_s1 + $0x20] sm:$0xff]   ;;  %v55_v15 = vld [vmem:[%s1079_s2 + $0x10] sm:$0xff] }
   0x5   :  { %v758_v12 = vld [vmem:[%s1078_s1 + $0x60] sm:$0xff]   ;;  %v760_v16 = vld [vmem:[%s1078_s1 + $0x68] sm:$0xff]   ;;  %v761_v17 = vld [vmem:[%s1078_s1 + $0x30] sm:$0xff]   ;;  %97 = vperm.xlu1 %748, %v55_v15  }
   0x6   :  { %710 = vmatmul.mubr.msk.bf16.vlgmr.msra.gmra.mxu0 %vm326_vm1, %v751_v4  ;;  %726 = vmatmul.mubr.msk.bf16.vlgmr.msra.gmra.mxu1 %vm326_vm1, %v752_v6  ;;  %v53_v13 = vld [vmem:[%s1079_s2] sm:$0xff]  ;;  %v54_v18 = vld [vmem:[%s1079_s2 + $0x8] sm:$0xff]  ;;  %v762_v19 = vld [vmem:[%s1078_s1 + $0x70] sm:$0xff]  }
   0x7   :  { %713 = vmatprep.mubr.msk.bf16.mxu0 %vm326_vm1, %v753_v7  ;;  %729 = vmatprep.mubr.msk.bf16.mxu1 %vm326_vm1, %v754_v8  ;;  %v56_v20 = vld [vmem:[%s1079_s2 + $0x18] sm:$0xff]  ;;  %v57_v21 = vld [vmem:[%s1079_s2 + $0x20] sm:$0xff]  ;;  %v58_v22 = vld [vmem:[%s1079_s2 + $0x28] sm:$0xff] }
   0x8   :  { %87 = vperm.xlu0 %747, %v53_v13   ;;  %v763_v23 = vld [vmem:[%s1078_s1 + $0x38] sm:$0xff]   ;;  %v59_v25 = vld [vmem:[%s1079_s2 + $0x30] sm:$0xff] }
   0x9   :  { %102 = vperm.xlu1 %748, %v56_v20   ;;  %v764_v24 = vld [vmem:[%s1078_s1 + $0x78] sm:$0xff]  }
   0xc   :  { %92 = vperm.xlu0 %747, %v54_v18  }
   0xd   :  { %112 = vperm.xlu1 %748, %v58_v22  }
   0xe   :  { %714 = vmatmul.mubr.msk.bf16.gmra.mxu0 %vm326_vm1, %v755_v9  ;;  %730 = vmatmul.mubr.msk.bf16.gmra.mxu1 %vm326_vm1, %v756_v10 }
   0xf   :  { %717 = vmatprep.mubr.msk.bf16.mxu0 %vm326_vm1, %v757_v11  ;;  %733 = vmatprep.mubr.msk.bf16.mxu1 %vm326_vm1, %v758_v12 }
  0x10   :  { %107 = vperm.xlu0 %747, %v57_v21  }
  0x16   :  { %718 = vmatmul.mubr.msk.bf16.gmra.mxu0 %vm326_vm1, %v759_v14  ;;  %734 = vmatmul.mubr.msk.bf16.gmra.mxu1 %vm326_vm1, %v760_v16 }
  0x17   :  { %721 = vmatprep.mubr.msk.bf16.mxu0 %vm326_vm1, %v761_v17  ;;  %737 = vmatprep.mubr.msk.bf16.mxu1 %vm326_vm1, %v762_v19 }
  0x18   :  { %10 = vsyncpa [#allocation4], 0  ;;  %v60_v26 = vld [vmem:[%s1079_s2 + $0x38] sm:$0xff]  ;;  %117 = vperm.xlu0 %747, %v59_v25   ;;  %v61_v27 = vld [vmem:[%s1079_s2 + $0x40] sm:$0xff]  ;;  %s852_s30 = smov [#allocation3]  }
  0x19   :  { %122 = vperm.xlu1 %748, %v60_v26   ;;  %v62_v28 = vld [vmem:[%s1079_s2 + $0x48] sm:$0xff]  ;;  %v63_v29 = vld [vmem:[%s1079_s2 + $0x50] sm:$0xff]  ;;  %v64_v30 = vld [vmem:[%s1079_s2 + $0x58] sm:$0xff]  ;;  %s650_s5 = sshll.u32 %s852_s30, 4  ;;  %s651_s5 = int_to_ptr.vmem [resolvable:$true] %s650_s5 }
  0x1a   :  { %v65_v31 = vld [vmem:[%s1079_s2 + $0x60] sm:$0xff]  ;;  %v66_v32 = vld [vmem:[%s1079_s2 + $0x68] sm:$0xff]  ;;  %v67_v33 = vld [vmem:[%s1079_s2 + $0x70] sm:$0xff]  ;;  %s829_s6 = scalar_lea.vmem %s651_s5, 16  ;;  %s833_s7 = scalar_lea.vmem %s651_s5, 32 }
  0x1b   :  { %v68_v34 = vld [vmem:[%s1079_s2 + $0x78] sm:$0xff]  ;;  %v69_v35 = vld [vmem:[%s1079_s2 + $0x80] sm:$0xff]  ;;  %v70_v36 = vld [vmem:[%s1079_s2 + $0x88] sm:$0xff]  ;;  %p830_p0 = scmp.ne.s32.totalorder %s651_s5, %s829_s6  ;;  %p834_p1 = scmp.lt.s32.totalorder %s651_s5, %s651_s5 }
  0x1c   :  { %127 = vperm.xlu0 %747, %v61_v27   ;;  %v71_v37 = vld [vmem:[%s1079_s2 + $0x90] sm:$0xff]  ;;  %v72_v38 = vld [vmem:[%s1079_s2 + $0x98] sm:$0xff]  ;;  %v73_v39 = vld [vmem:[%s1079_s2 + $0xa0] sm:$0xff]  ;;  %p835_p2 = scmp.lt.s32.totalorder %s833_s7, %s829_s6 }
  0x1d   :  { %132 = vperm.xlu1 %748, %v62_v28   ;;  %v74_v40 = vld [vmem:[%s1079_s2 + $0xa8] sm:$0xff]  ;;  %v75_v41 = vld [vmem:[%s1079_s2 + $0xb0] sm:$0xff]  ;;  %v76_v42 = vld [vmem:[%s1079_s2 + $0xb8] sm:$0xff] }
  0x1e   :  { %722 = vmatmul.mubr.msk.bf16.gmra.mxu0 %vm326_vm1, %v763_v23  ;;  %738 = vmatmul.mubr.msk.bf16.gmra.mxu1 %vm326_vm1, %v764_v24  ;;  %v77_v43 = vld [vmem:[%s1079_s2 + $0xc0] sm:$0xff]  ;;  %v78_v44 = vld [vmem:[%s1079_s2 + $0xc8] sm:$0xff]  ;;  %v79_v45 = vld [vmem:[%s1079_s2 + $0xd0] sm:$0xff]  ;;  %p836_p3 = por %p835_p2, %p834_p1 }
  0x1f   :  { %v80_v46 = vld [vmem:[%s1079_s2 + $0xd8] sm:$0xff]  ;;  %v81_v47 = vld [vmem:[%s1079_s2 + $0xe0] sm:$0xff]  ;;  %v82_v48 = vld [vmem:[%s1079_s2 + $0xe8] sm:$0xff] }
  0x20   :  { %137 = vperm.xlu0 %747, %v63_v29   ;;  %v83_v49 = vld [vmem:[%s1079_s2 + $0xf0] sm:$0xff]  ;;  %v84_v50 = vld [vmem:[%s1079_s2 + $0xf8] sm:$0xff]  ;;  %p837_p4 = pnand %p836_p3, %p830_p0 }
  0x21   :  { %142 = vperm.xlu1 %748, %v64_v30  }
  0x24   :  { %147 = vperm.xlu0 %747, %v65_v31  }
  0x25   :  { %152 = vperm.xlu1 %748, %v66_v32  }
  0x28   :  { %157 = vperm.xlu0 %747, %v67_v33  }
  0x29   :  { %162 = vperm.xlu1 %748, %v68_v34  }
  0x2c   :  { %167 = vperm.xlu0 %747, %v69_v35  }
  0x2d   :  { %172 = vperm.xlu1 %748, %v70_v36  }
  0x30   :  { %177 = vperm.xlu0 %747, %v71_v37  }
  0x31   :  { %182 = vperm.xlu1 %748, %v72_v38  }
  0x34   :  { %187 = vperm.xlu0 %747, %v73_v39  }
  0x35   :  { %192 = vperm.xlu1 %748, %v74_v40  }
  0x38   :  { %197 = vperm.xlu0 %747, %v75_v41  }
  0x39   :  { %202 = vperm.xlu1 %748, %v76_v42  }
  0x3c   :  { %207 = vperm.xlu0 %747, %v77_v43  }
  0x3d   :  { %212 = vperm.xlu1 %748, %v78_v44  }
  0x40   :  { %217 = vperm.xlu0 %747, %v79_v45  }
  0x41   :  { %222 = vperm.xlu1 %748, %v80_v46  }
  0x44   :  { %227 = vperm.xlu0 %747, %v81_v47  }
  0x45   :  { %232 = vperm.xlu1 %748, %v82_v48  }
  0x48   :  { %237 = vperm.xlu0 %747, %v83_v49  }
  0x49   :  { %242 = vperm.xlu1 %748, %v84_v50  }
  0x80   :  { %v98_v52 = vpop.permute.xlu1 %97 }
  0x83   :  { %v88_v51 = vpop.permute.xlu0 %87 }
  0x84   :  { %v103_v54 = vpop.permute.xlu1 %102 }
  0x87   :  { %v93_v53 = vpop.permute.xlu0 %92 }
  0x88   :  { %v113_v57 = vpop.permute.xlu1 %112 }
  0x8b   :  { %v108_v55 = vpop.permute.xlu0 %107 }
  0x93   :  { %v118_v62 = vpop.permute.xlu0 %117 }
  0x94   :  { %v123_v1 = vpop.permute.xlu1 %122 }
  0x97   :  { %v128_v5 = vpop.permute.xlu0 %127 }
  0x98   :  { %v1049_v7 = vpop.permute.xlu1 %132 }
  0x9b   :  { %v1053_v11 = vpop.permute.xlu0 %137 }
  0x9c   :  { %v143_v16 = vpop.permute.xlu1 %142 }
  0x9f   :  { %v148_v24 = vpop.permute.xlu0 %147 }
  0xa0   :  { %v153_v29 = vpop.permute.xlu1 %152 }
  0xa3   :  { %v158_v39 = vpop.permute.xlu0 %157 }
  0xa4   :  { %v163_v48 = vpop.permute.xlu1 %162 }
  0xc6   :  { %v711_v56 = vpop.f32.mrf.mxu0  ;;  %v1041_v58 = vpop.f32.mrf.mxu1 }
  0xc8   :  { %v413_v59 = vpop.f32.mrf.mxu0  ;;  %v1043_v60 = vpop.f32.mrf.mxu1 }
  0xc9   :  { %765 = vtanh.f32 %v413_v59 }
  0xca   :  { %v712_v61 = vpop.f32.mrf.mxu0  ;;  %767 = vtanh.f32 %v711_v56  ;;  %v1045_v63 = vpop.f32.mrf.mxu1 }
  0xcb   :  { %v168_v56 = vpop.permute.xlu0 %167 }
  0xcc   :  { %v416_v0 = vpop.f32.mrf.mxu0  ;;  %v1047_v3 = vpop.f32.mrf.mxu1 }
  0xcd   :  { %769 = vtanh.f32 %v416_v0 }
  0xce   :  { %v715_v2 = vpop.f32.mrf.mxu0  ;;  %771 = vtanh.f32 %v712_v61  ;;  %v1051_v8 = vpop.f32.mrf.mxu1 }
  0xd0   :  { %v429_v4 = vpop.f32.mrf.mxu0  ;;  %v1055_v13 = vpop.f32.mrf.mxu1 }
  0xd1   :  { %773 = vtanh.f32 %v429_v4 }
  0xd2   :  { %v716_v6 = vpop.f32.mrf.mxu0  ;;  %775 = vtanh.f32 %v715_v2  ;;  %v1057_v22 = vpop.f32.mrf.mxu1 }
  0xd4   :  { %v432_v9 = vpop.f32.mrf.mxu0  ;;  %v496_v32 = vpop.f32.mrf.mxu1 }
  0xd5   :  { %777 = vtanh.f32 %v432_v9 }
  0xd6   :  { %v719_v10 = vpop.f32.mrf.mxu0  ;;  %779 = vtanh.f32 %v716_v6  ;;  %v766_v12 = vpop.eup %765 }
  0xd7   :  { %v768_v15 = vpop.eup %767  ;;  %v572_v19 = vmul.f32 %v766_v12, %v88_v51  ;;  %v1059_v43 = vpop.f32.mrf.mxu1 }
  0xd8   :  { %v445_v14 = vpop.f32.mrf.mxu0  ;;  %v574_v25 = vmul.f32 %v768_v15, %v98_v52  ;;  %v178_v6 = vpop.permute.xlu0 %177 }
  0xd9   :  { %781 = vtanh.f32 %v445_v14  ;;  %v509_v51 = vpop.f32.mrf.mxu1 }
  0xda   :  { %v770_v17 = vpop.eup %769  ;;  %v720_v18 = vpop.f32.mrf.mxu0  ;;  %783 = vtanh.f32 %v719_v10 }
  0xdb   :  { %v573_v20 = vmul.f32 %v770_v17, %v93_v53  ;;  %v772_v21 = vpop.eup %771  ;;  %v736_v0 = vpop.f32.mrf.mxu1 }
  0xdc   :  { %v448_v23 = vpop.f32.mrf.mxu0  ;;  %v575_v30 = vmul.f32 %v772_v21, %v103_v54 }
  0xdd   :  { %v604_v26 = vadd.f32 %v573_v20, %v572_v19  ;;  %785 = vtanh.f32 %v448_v23  ;;  %v512_v9 = vpop.f32.mrf.mxu1  ;;  %v188_v19 = vpop.permute.xlu0 %187 }
  0xde   :  { %v774_v27 = vpop.eup %773  ;;  %v723_v28 = vpop.f32.mrf.mxu0  ;;  %787 = vtanh.f32 %v720_v18 }
  0xdf   :  { %v605_v31 = vadd.f32 %v604_v26, %v574_v25  ;;  %v776_v34 = vpop.eup %775  ;;  %v576_v35 = vmul.f32 %v774_v27, %v108_v55 }
  0xe0   :  { %v461_v33 = vpop.f32.mrf.mxu0  ;;  %v578_v45 = vmul.f32 %v776_v34, %v118_v62  ;;  %v173_v62 = vpop.permute.xlu1 %172 }
  0xe1   :  { %v606_v36 = vadd.f32 %v605_v31, %v575_v30  ;;  %789 = vtanh.f32 %v461_v33 }
  0xe2   :  { %v778_v37 = vpop.eup %777  ;;  %v724_v38 = vpop.f32.mrf.mxu0  ;;  %791 = vtanh.f32 %v723_v28 }
  0xe3   :  { %v607_v40 = vadd.f32 %v606_v36, %v576_v35  ;;  %v577_v41 = vmul.f32 %v778_v37, %v113_v57  ;;  %v780_v42 = vpop.eup %779 }
  0xe4   :  { %v464_v44 = vpop.f32.mrf.mxu0  ;;  %v579_v49 = vmul.f32 %v780_v42, %v123_v1  ;;  %v183_v14 = vpop.permute.xlu1 %182 }
  0xe5   :  { %v608_v46 = vadd.f32 %v607_v40, %v577_v41  ;;  %793 = vtanh.f32 %v464_v44 }
  0xe6   :  { %v782_v47 = vpop.eup %781  ;;  %795 = vtanh.f32 %v724_v38 }
  0xe7   :  { %v609_v50 = vadd.f32 %v608_v46, %v578_v45  ;;  %v784_v52 = vpop.eup %783  ;;  %797 = vtanh.f32 %v1043_v60  ;;  %v580_v53 = vmul.f32 %v782_v47, %v128_v5 }
  0xe8   :  { %799 = vtanh.f32 %v1047_v3  ;;  %v582_v1 = vmul.f32 %v784_v52, %v1053_v11  ;;  %v739_v11 = vpop.f32.mrf.mxu1  ;;  %v193_v23 = vpop.permute.xlu1 %192 }
  0xe9   :  { %v610_v54 = vadd.f32 %v609_v50, %v579_v49  ;;  %801 = vtanh.f32 %v1041_v58 }
  0xea   :  { %v786_v55 = vpop.eup %785  ;;  %803 = vtanh.f32 %v1045_v63 }
  0xeb   :  { %v611_v57 = vadd.f32 %v610_v54, %v580_v53  ;;  %v581_v59 = vmul.f32 %v786_v55, %v1049_v7  ;;  %v788_v61 = vpop.eup %787  ;;  %805 = vtanh.f32 %v1055_v13 }
  0xec   :  { %v583_v60 = vmul.f32 %v788_v61, %v143_v16  ;;  %807 = vtanh.f32 %v496_v32  ;;  %v203_v34 = vpop.permute.xlu1 %202 }
  0xed   :  { %v612_v2 = vadd.f32 %v611_v57, %v581_v59  ;;  %809 = vtanh.f32 %v1051_v8  ;;  %v198_v8 = vpop.permute.xlu0 %197 }
  0xee   :  { %v790_v4 = vpop.eup %789  ;;  %811 = vtanh.f32 %v1057_v22 }
  0xef   :  { %v613_v5 = vadd.f32 %v612_v2, %v582_v1  ;;  %v792_v10 = vpop.eup %791  ;;  %v584_v3 = vmul.f32 %v790_v4, %v148_v24  ;;  %v525_v24 = vpop.f32.mrf.mxu1  ;;  %813 = vtanh.f32 %v509_v51 }
  0xf0   :  { %v586_v18 = vmul.f32 %v792_v10, %v158_v39  ;;  %815 = vtanh.f32 %v512_v9  ;;  %v213_v47 = vpop.permute.xlu1 %212 }
  0xf1   :  { %v614_v7 = vadd.f32 %v613_v5, %v583_v60  ;;  %v740_v31 = vpop.f32.mrf.mxu1  ;;  %817 = vtanh.f32 %v1059_v43  ;;  %v208_v42 = vpop.permute.xlu0 %207 }
  0xf2   :  { %v794_v12 = vpop.eup %793  ;;  %819 = vtanh.f32 %v736_v0 }
  0xf3   :  { %v615_v15 = vadd.f32 %v614_v7, %v584_v3  ;;  %v585_v58 = vmul.f32 %v794_v12, %v153_v29  ;;  %v796_v17 = vpop.eup %795  ;;  %v528_v38 = vpop.f32.mrf.mxu1  ;;  %821 = vtanh.f32 %v525_v24 }
  0xf4   :  { %v798_v16 = vpop.eup %797  ;;  %v587_v20 = vmul.f32 %v796_v17, %v163_v48  ;;  %823 = vtanh.f32 %v528_v38  ;;  %v223_v57 = vpop.permute.xlu1 %222 }
  0xf5   :  { %v616_v63 = vadd.f32 %v615_v15, %v585_v58  ;;  %v800_v13 = vpop.eup %799  ;;  %v588_v25 = vmul.f32 %v798_v16, %v168_v56  ;;  %825 = vtanh.f32 %v739_v11  ;;  %v218_v53 = vpop.permute.xlu0 %217 }
  0xf6   :  { %v802_v27 = vpop.eup %801  ;;  %v589_v28 = vmul.f32 %v800_v13, %v173_v62  ;;  %827 = vtanh.f32 %v740_v31 }
  0xf7   :  { %v617_v21 = vadd.f32 %v616_v63, %v586_v18  ;;  %v804_v30 = vpop.eup %803  ;;  %v590_v32 = vmul.f32 %v802_v27, %v178_v6 }
  0xf8   :  { %v806_v22 = vpop.eup %805  ;;  %v591_v35 = vmul.f32 %v804_v30, %v183_v14  ;;  %v233_v9 = vpop.permute.xlu1 %232 }
  0xf9   :  { %v618_v26 = vadd.f32 %v617_v21, %v587_v20  ;;  %v808_v37 = vpop.eup %807  ;;  %v592_v39 = vmul.f32 %v806_v22, %v188_v19  ;;  %v228_v4 = vpop.permute.xlu0 %227 }
  0xfa   :  { %v810_v41 = vpop.eup %809  ;;  %v593_v44 = vmul.f32 %v808_v37, %v193_v23 }
  0xfb   :  { %v619_v29 = vadd.f32 %v618_v26, %v588_v25  ;;  %v812_v46 = vpop.eup %811  ;;  %v594_v48 = vmul.f32 %v810_v41, %v198_v8  ;;  %v641_v25 = vstv %s1080_s3 }
  0xfc   :  { %v814_v49 = vpop.eup %813  ;;  %v595_v50 = vmul.f32 %v812_v46, %v203_v34  ;;  %v243_v18 = vpop.permute.xlu1 %242 }
  0xfd   :  { %v620_v33 = vadd.f32 %v619_v29, %v589_v28  ;;  %v816_v52 = vpop.eup %815  ;;  %v596_v54 = vmul.f32 %v814_v49, %v208_v42  ;;  %v238_v58 = vpop.permute.xlu0 %237 }
  0xfe   :  { %v818_v56 = vpop.eup %817  ;;  %v597_v59 = vmul.f32 %v816_v52, %v213_v47 }
  0xff   :  { %v621_v36 = vadd.f32 %v620_v33, %v590_v32  ;;  %v820_v62 = vpop.eup %819  ;;  %v598_v0 = vmul.f32 %v818_v56, %v218_v53 }
 0x100   :  { %v822_v2 = vpop.eup %821  ;;  %v599_v60 = vmul.f32 %v820_v62, %v223_v57 }
 0x101   :  { %v622_v40 = vadd.f32 %v621_v36, %v591_v35  ;;  %v824_v6 = vpop.eup %823  ;;  %v600_v10 = vmul.f32 %v822_v2, %v228_v4 }
 0x102   :  { %v826_v7 = vpop.eup %825  ;;  %v601_v12 = vmul.f32 %v824_v6, %v233_v9 }
 0x103   :  { %v623_v45 = vadd.f32 %v622_v40, %v592_v39  ;;  %v828_v15 = vpop.eup %827  ;;  %v602_v17 = vmul.f32 %v826_v7, %v238_v58 }
 0x104   :  { %v603_v63 = vmul.f32 %v828_v15, %v243_v18 }
 0x105   :  { %v624_v43 = vadd.f32 %v623_v45, %v593_v44 }
 0x107   :  { %v625_v51 = vadd.f32 %v624_v43, %v594_v48 }
 0x109   :  { %v626_v55 = vadd.f32 %v625_v51, %v595_v50 }
 0x10b   :  { %v627_v61 = vadd.f32 %v626_v55, %v596_v54 }
 0x10d   :  { %v628_v1 = vadd.f32 %v627_v61, %v597_v59 }
 0x10f   :  { %v629_v5 = vadd.f32 %v628_v1, %v598_v0 }
 0x111   :  { %v630_v3 = vadd.f32 %v629_v5, %v599_v60 }
 0x113   :  { %v631_v14 = vadd.f32 %v630_v3, %v600_v10 }
 0x115   :  { %v632_v11 = vadd.f32 %v631_v14, %v601_v12 }
 0x117   :  { %v633_v16 = vadd.f32 %v632_v11, %v602_v17 }
 0x119   :  { %v634_v19 = vadd.f32 %v633_v16, %v603_v63 }
 0x11b   :  { %v635_v20 = vrot.slane %v634_v19, 4 }
 0x11d   :  { %v636_v21 = vadd.f32 %v635_v20, %v634_v19 }
 0x11f   :  { %v637_v13 = vrot.slane %v636_v21, 2 }
 0x121   :  { %v638_v23 = vadd.f32 %v637_v13, %v636_v21 }
 0x123   :  { %v639_v24 = vrot.slane %v638_v23, 1 }
 0x125   :  { %v640_v26 = vadd.f32 %v639_v24, %v638_v23 }
 0x127   :  { %v642_v27 = vadd.f32 %v641_v25, %v640_v26 }
 0x129   :  { %643 = vst [vmem:[#allocation3] sm:$0x1] %v642_v27 }
 0x12a   :  { %840 = shalt.err (!%p837_p4)
}
 0x12b   :  { %653 = dma.vmem_to_hbm [thread:$0]  %s651_s5, 16, %s1081_s4, [#allocation4]  }
 0x12c   :  { %849 = dma.done.wait [#allocation4], 16  }
 0x12d   :  { %850 = vsyncadd [#allocation4], 4294967280 }
 0x12e   :  { %657 = vsyncpa [#allocation4], 1 }

</bundles_post_ra>
